<compile_context>
chip_gen: v7x
topology: tpu7x:2x2x1
jax: 0.10.0
libtpu: 0.0.40
codegen_flags: <defaults>
</compile_context>

<pallas_src>
import functools

import jax
import jax.numpy as jnp
from jax.experimental import pallas as pl
from jax.experimental.pallas import tpu as pltpu


_LANE = 128  # TPU vreg lane width; head outputs are padded to multiples of this.


def _round_up(x, m):
    return ((x + m - 1) // m) * m


def _trunk(s_ref, w0_ref, b0_ref, w1_ref, b1_ref, w2_ref, b2_ref):
    """Shared MLP trunk: 3x (Linear + ReLU), f32 accumulation on the MXU."""
    x = jnp.dot(s_ref[...], w0_ref[...], preferred_element_type=jnp.float32)
    x = jnp.maximum(x + b0_ref[...], 0.0)
    x = jnp.dot(x, w1_ref[...], preferred_element_type=jnp.float32)
    x = jnp.maximum(x + b1_ref[...], 0.0)
    x = jnp.dot(x, w2_ref[...], preferred_element_type=jnp.float32)
    x = jnp.maximum(x + b2_ref[...], 0.0)
    return x


def _mean_kernel(s_ref, w0_ref, b0_ref, w1_ref, b1_ref, w2_ref, b2_ref,
                 wm_ref, bm_ref, mean_ref):
    x = _trunk(s_ref, w0_ref, b0_ref, w1_ref, b1_ref, w2_ref, b2_ref)
    mean = jnp.dot(x, wm_ref[...], preferred_element_type=jnp.float32) + bm_ref[...]
    mean_ref[...] = mean.astype(mean_ref.dtype)


def _mean_std_kernel(s_ref, w0_ref, b0_ref, w1_ref, b1_ref, w2_ref, b2_ref,
                     wh_ref, bh_ref, mean_ref, std_ref,
                     *, pad_a, log_std_min, log_std_max):
    x = _trunk(s_ref, w0_ref, b0_ref, w1_ref, b1_ref, w2_ref, b2_ref)
    # Fused head: one MXU matmul, a_mean slab in lanes [0,pad_a),
    # log_std slab in [pad_a, 2*pad_a).  pad_a is a multiple of 128, so the
    # static slab slices are vreg-aligned (no lane crossing, no iota/select).
    head = jnp.dot(x, wh_ref[...], preferred_element_type=jnp.float32) + bh_ref[...]
    mean_ref[...] = head[:, :pad_a].astype(mean_ref.dtype)
    log_std = jnp.clip(head[:, pad_a:], log_std_min, log_std_max)
    std_ref[...] = jnp.exp(log_std).astype(std_ref.dtype)  # EUP, std slab only


class ActorSACPallas:
    """JAX/Pallas port of ActorSAC. Parameters initialized deterministically."""

    # Rows per grid step; sized so tile + resident weights + double-buffered
    # lane-padded outputs stay well under even v5e's 16 MiB default scoped VMEM.
    MAX_BATCH_TILE = 2048

    def __init__(self, state_dim, action_dim, mid_dim, use_densenet=0, seed=0):
        del use_densenet  # only affects an unused counter in the original __init__
        self.log_std_max = 2.0
        self.log_std_min = -20.0
        self.state_dim = state_dim
        self.action_dim = action_dim
        self.mid_dim = mid_dim
        self.pad_a = _round_up(max(action_dim, 1), _LANE)

        key = jax.random.PRNGKey(seed)
        ks = jax.random.split(key, 10)

        def linear(kw, kb, fan_in, fan_out, w_scale=1.0):
            bound = 1.0 / jnp.sqrt(fan_in)
            w = jax.random.uniform(kw, (fan_in, fan_out), jnp.float32, -bound, bound)
            b = jax.random.uniform(kb, (1, fan_out), jnp.float32, -bound, bound)
            return w * w_scale, b

        # net: Linear(state_dim, mid_dim)+ReLU, then LinearNet(mid_dim) = 2x(Linear+ReLU)
        self.w0, self.b0 = linear(ks[0], ks[1], state_dim, mid_dim)
        self.w1, self.b1 = linear(ks[2], ks[3], mid_dim, mid_dim)
        self.w2, self.b2 = linear(ks[4], ks[5], mid_dim, mid_dim)
        # net__a_mean: layer_norm(layer, std=0.01) -> small-scale weight init
        self.wm, self.bm = linear(ks[6], ks[7], mid_dim, action_dim, w_scale=0.01)
        # net__log_std
        self.ws, self.bs = linear(ks[8], ks[9], mid_dim, action_dim)

        self.refresh_fused_head()

    def refresh_fused_head(self):
        """(Re)build the lane-padded / fused head params from wm/bm/ws/bs.

        Must be called again whenever wm/bm/ws/bs are updated (training or
        checkpoint loading) so the fused slabs do not go stale.
        """
        A, P = self.action_dim, self.pad_a

        def pad_cols(w, b):
            wp = jnp.zeros((self.mid_dim, P), jnp.float32).at[:, :A].set(w)
            bp = jnp.zeros((1, P), jnp.float32).at[:, :A].set(b)
            return wp, bp

        self.wm_pad, self.bm_pad = pad_cols(self.wm, self.bm)   # mean-only path
        ws_pad, bs_pad = pad_cols(self.ws, self.bs)
        # Fused head: a_mean slab in lanes [0, P), log_std slab in [P, 2P).
        self.wh = jnp.concatenate([self.wm_pad, ws_pad], axis=1)  # [mid, 2P]
        self.bh = jnp.concatenate([self.bm_pad, bs_pad], axis=1)  # [1, 2P]

    def __call__(self, s, noise_std=0.0):
        # noise_std must be a static Python number (matches the PyTorch module,
        # whose `if noise_std:` is also a host-side branch).
        compute_std = bool(noise_std)
        A, P = self.action_dim, self.pad_a
        batch = s.shape[0]

        # Large batch tiles: this kernel is latency/overhead-bound, so fewer,
        # bigger grid steps win.  tb is a multiple of 8 (sublanes); the last
        # (ragged) block reads garbage rows and its OOB output rows are masked
        # by Pallas, so no wrapper-side padding copy of `s` is needed.
        tb = min(self.MAX_BATCH_TILE, _round_up(batch, 8))
        grid = (pl.cdiv(batch, tb),)
        # Megacore split (v7x) only pays off with >= 2 independent batch tiles.
        semantics = ("parallel",) if grid[0] > 1 else ("arbitrary",)

        def resident(arr):  # weights/biases: same VMEM block every grid step
            return pl.BlockSpec(arr.shape, lambda i: (0, 0))

        state_spec = pl.BlockSpec((tb, self.state_dim), lambda i: (i, 0))
        head_spec = pl.BlockSpec((tb, P), lambda i: (i, 0))      # lane-dense store
        head_out = jax.ShapeDtypeStruct((batch, P), jnp.float32)

        if compute_std:
            kernel = functools.partial(
                _mean_std_kernel,
                pad_a=P,
                log_std_min=self.log_std_min,
                log_std_max=self.log_std_max,
            )
            mean_p, std_p = pl.pallas_call(
                kernel,
                out_shape=(head_out, head_out),
                grid=grid,
                in_specs=[
                    state_spec,
                    resident(self.w0), resident(self.b0),
                    resident(self.w1), resident(self.b1),
                    resident(self.w2), resident(self.b2),
                    resident(self.wh), resident(self.bh),
                ],
                out_specs=(head_spec, head_spec),
                compiler_params=pltpu.CompilerParams(
                    dimension_semantics=semantics),
            )(s, self.w0, self.b0, self.w1, self.b1, self.w2, self.b2,
              self.wh, self.bh)
            return mean_p[:, :A], std_p[:, :A]

        mean_p = pl.pallas_call(
            _mean_kernel,
            out_shape=head_out,
            grid=grid,
            in_specs=[
                state_spec,
                resident(self.w0), resident(self.b0),
                resident(self.w1), resident(self.b1),
                resident(self.w2), resident(self.b2),
                resident(self.wm_pad), resident(self.bm_pad),
            ],
            out_specs=head_spec,
            compiler_params=pltpu.CompilerParams(
                dimension_semantics=semantics),
        )(s, self.w0, self.b0, self.w1, self.b1, self.w2, self.b2,
          self.wm_pad, self.bm_pad)
        return mean_p[:, :A]

    # Pure-JAX reference for correctness checking.
    def reference(self, s, noise_std=0.0):
        x = jnp.maximum(s @ self.w0 + self.b0, 0.0)
        x = jnp.maximum(x @ self.w1 + self.b1, 0.0)
        x = jnp.maximum(x @ self.w2 + self.b2, 0.0)
        a_mean = x @ self.wm + self.bm
        if noise_std:
            log_std = jnp.clip(x @ self.ws + self.bs, self.log_std_min, self.log_std_max)
            return a_mean, jnp.exp(log_std)
        return a_mean


if __name__ == "__main__":
    state_dim, action_dim, mid_dim = 16, 4, 32
    actor = ActorSACPallas(state_dim, action_dim, mid_dim, use_densenet=0, seed=0)

    # Small demo batch.
    batch = 8
    s = jax.random.normal(jax.random.PRNGKey(0), (batch, state_dim), jnp.float32)

    # Default path: noise_std=0.0 -> a_mean only (log_std head skipped in-kernel).
    a_mean = jax.block_until_ready(actor(s))
    # Exploration path: noise_std != 0 -> (a_mean, a_std), fused lane-padded head.
    a_mean2, a_std = jax.block_until_ready(actor(s, noise_std=0.5))

    ref_mean = actor.reference(s)
    ref_mean2, ref_std = actor.reference(s, noise_std=0.5)

    assert a_mean.shape == (batch, action_dim)
    assert a_std.shape == (batch, action_dim)
    assert jnp.allclose(a_mean, ref_mean, atol=1e-5, rtol=1e-5)
    assert jnp.allclose(a_mean2, ref_mean2, atol=1e-5, rtol=1e-5)
    assert jnp.allclose(a_std, ref_std, atol=1e-5, rtol=1e-5)

    # Larger, non-multiple-of-8 batch: exercises the ragged last block (masked
    # OOB reads/writes) without any wrapper-side padding.
    batch2 = 100
    s2 = jax.random.normal(jax.random.PRNGKey(1), (batch2, state_dim), jnp.float32)
    m2, std2 = jax.block_until_ready(actor(s2, noise_std=1.0))
    rm2, rstd2 = actor.reference(s2, noise_std=1.0)
    assert m2.shape == (batch2, action_dim) and std2.shape == (batch2, action_dim)
    assert jnp.allclose(m2, rm2, atol=1e-5, rtol=1e-5)
    assert jnp.allclose(std2, rstd2, atol=1e-5, rtol=1e-5)

    print("KERNEL_OK")
</pallas_src>

<mosaic_0001>
module attributes {stable_mosaic.version = 11 : i64} {
  func.func @_mean_kernel(%arg0: i32, %arg1: memref<8x16xf32, #tpu.memory_space<vmem>>, %arg2: memref<16x32xf32, #tpu.memory_space<vmem>>, %arg3: memref<1x32xf32, #tpu.memory_space<vmem>>, %arg4: memref<32x32xf32, #tpu.memory_space<vmem>>, %arg5: memref<1x32xf32, #tpu.memory_space<vmem>>, %arg6: memref<32x32xf32, #tpu.memory_space<vmem>>, %arg7: memref<1x32xf32, #tpu.memory_space<vmem>>, %arg8: memref<32x128xf32, #tpu.memory_space<vmem>>, %arg9: memref<1x128xf32, #tpu.memory_space<vmem>>, %arg10: memref<8x128xf32, #tpu.memory_space<vmem>>) attributes {dimension_semantics = [#tpu.dimension_semantics<arbitrary>], iteration_bounds = array<i64: 1>, scalar_prefetch = 0 : i64, scratch_operands = 0 : i64, tpu.core_type = #tpu.core_type<tc>, window_params = [{transform_indices = @transform_0, window_bounds = array<i64: 8, 16>}, {pipeline_mode = #tpu.pipeline_mode<synchronous>, transform_indices = @transform_1, window_bounds = array<i64: 16, 32>}, {pipeline_mode = #tpu.pipeline_mode<synchronous>, transform_indices = @transform_2, window_bounds = array<i64: 1, 32>}, {pipeline_mode = #tpu.pipeline_mode<synchronous>, transform_indices = @transform_3, window_bounds = array<i64: 32, 32>}, {pipeline_mode = #tpu.pipeline_mode<synchronous>, transform_indices = @transform_4, window_bounds = array<i64: 1, 32>}, {pipeline_mode = #tpu.pipeline_mode<synchronous>, transform_indices = @transform_5, window_bounds = array<i64: 32, 32>}, {pipeline_mode = #tpu.pipeline_mode<synchronous>, transform_indices = @transform_6, window_bounds = array<i64: 1, 32>}, {pipeline_mode = #tpu.pipeline_mode<synchronous>, transform_indices = @transform_7, window_bounds = array<i64: 32, 128>}, {pipeline_mode = #tpu.pipeline_mode<synchronous>, transform_indices = @transform_8, window_bounds = array<i64: 1, 128>}, {transform_indices = @transform_9, window_bounds = array<i64: 8, 128>}]} {
    %c0 = arith.constant 0 : index
    %c0_0 = arith.constant 0 : index
    %0 = vector.load %arg1[%c0, %c0_0] : memref<8x16xf32, #tpu.memory_space<vmem>>, vector<8x16xf32>
    %c0_1 = arith.constant 0 : index
    %c0_2 = arith.constant 0 : index
    %1 = vector.load %arg2[%c0_1, %c0_2] : memref<16x32xf32, #tpu.memory_space<vmem>>, vector<16x32xf32>
    %cst = arith.constant dense<0.000000e+00> : vector<8x32xf32>
    %2 = tpu.matmul %0, %1, %cst {dimension_numbers = #tpu.dot_dimension_numbers<[1], [0], [0], [1], [0, 0, 1, 1], [], []>} : vector<8x16xf32>, vector<16x32xf32>, vector<8x32xf32> -> vector<8x32xf32>
    %c0_3 = arith.constant 0 : index
    %c0_4 = arith.constant 0 : index
    %3 = vector.load %arg3[%c0_3, %c0_4] : memref<1x32xf32, #tpu.memory_space<vmem>>, vector<1x32xf32>
    %4 = vector.broadcast %3 : vector<1x32xf32> to vector<8x32xf32>
    %5 = arith.addf %2, %4 : vector<8x32xf32>
    %cst_5 = arith.constant 0.000000e+00 : f32
    %6 = vector.broadcast %cst_5 : f32 to vector<8x32xf32>
    %7 = arith.maximumf %5, %6 : vector<8x32xf32>
    %c0_6 = arith.constant 0 : index
    %c0_7 = arith.constant 0 : index
    %8 = vector.load %arg4[%c0_6, %c0_7] : memref<32x32xf32, #tpu.memory_space<vmem>>, vector<32x32xf32>
    %cst_8 = arith.constant dense<0.000000e+00> : vector<8x32xf32>
    %9 = tpu.matmul %7, %8, %cst_8 {dimension_numbers = #tpu.dot_dimension_numbers<[1], [0], [0], [1], [0, 0, 1, 1], [], []>} : vector<8x32xf32>, vector<32x32xf32>, vector<8x32xf32> -> vector<8x32xf32>
    %c0_9 = arith.constant 0 : index
    %c0_10 = arith.constant 0 : index
    %10 = vector.load %arg5[%c0_9, %c0_10] : memref<1x32xf32, #tpu.memory_space<vmem>>, vector<1x32xf32>
    %11 = vector.broadcast %10 : vector<1x32xf32> to vector<8x32xf32>
    %12 = arith.addf %9, %11 : vector<8x32xf32>
    %cst_11 = arith.constant 0.000000e+00 : f32
    %13 = vector.broadcast %cst_11 : f32 to vector<8x32xf32>
    %14 = arith.maximumf %12, %13 : vector<8x32xf32>
    %c0_12 = arith.constant 0 : index
    %c0_13 = arith.constant 0 : index
    %15 = vector.load %arg6[%c0_12, %c0_13] : memref<32x32xf32, #tpu.memory_space<vmem>>, vector<32x32xf32>
    %cst_14 = arith.constant dense<0.000000e+00> : vector<8x32xf32>
    %16 = tpu.matmul %14, %15, %cst_14 {dimension_numbers = #tpu.dot_dimension_numbers<[1], [0], [0], [1], [0, 0, 1, 1], [], []>} : vector<8x32xf32>, vector<32x32xf32>, vector<8x32xf32> -> vector<8x32xf32>
    %c0_15 = arith.constant 0 : index
    %c0_16 = arith.constant 0 : index
    %17 = vector.load %arg7[%c0_15, %c0_16] : memref<1x32xf32, #tpu.memory_space<vmem>>, vector<1x32xf32>
    %18 = vector.broadcast %17 : vector<1x32xf32> to vector<8x32xf32>
    %19 = arith.addf %16, %18 : vector<8x32xf32>
    %cst_17 = arith.constant 0.000000e+00 : f32
    %20 = vector.broadcast %cst_17 : f32 to vector<8x32xf32>
    %21 = arith.maximumf %19, %20 : vector<8x32xf32>
    %c0_18 = arith.constant 0 : index
    %c0_19 = arith.constant 0 : index
    %22 = vector.load %arg8[%c0_18, %c0_19] : memref<32x128xf32, #tpu.memory_space<vmem>>, vector<32x128xf32>
    %cst_20 = arith.constant dense<0.000000e+00> : vector<8x128xf32>
    %23 = tpu.matmul %21, %22, %cst_20 {dimension_numbers = #tpu.dot_dimension_numbers<[1], [0], [0], [1], [0, 0, 1, 1], [], []>} : vector<8x32xf32>, vector<32x128xf32>, vector<8x128xf32> -> vector<8x128xf32>
    %c0_21 = arith.constant 0 : index
    %c0_22 = arith.constant 0 : index
    %24 = vector.load %arg9[%c0_21, %c0_22] : memref<1x128xf32, #tpu.memory_space<vmem>>, vector<1x128xf32>
    %25 = vector.broadcast %24 : vector<1x128xf32> to vector<8x128xf32>
    %26 = arith.addf %23, %25 : vector<8x128xf32>
    %c0_23 = arith.constant 0 : index
    %c0_24 = arith.constant 0 : index
    %27 = vector.load %arg10[%c0_23, %c0_24] : memref<8x128xf32, #tpu.memory_space<vmem>>, vector<8x128xf32>
    tpu.vector_store %arg10[%c0_23, %c0_24], %26 {strides = array<i32>} : memref<8x128xf32, #tpu.memory_space<vmem>>, vector<8x128xf32>,
    return
  }
  func.func @transform_0(%arg0: i32) -> (i32, i32) {
    %c0_i32 = arith.constant 0 : i32
    %c0_i32_0 = arith.constant 0 : i32
    return %arg0, %c0_i32 : i32, i32
  }
  func.func @transform_1(%arg0: i32) -> (i32, i32) {
    %c0_i32 = arith.constant 0 : i32
    %c0_i32_0 = arith.constant 0 : i32
    %c0_i32_1 = arith.constant 0 : i32
    return %c0_i32, %c0_i32_0 : i32, i32
  }
  func.func @transform_2(%arg0: i32) -> (i32, i32) {
    %c0_i32 = arith.constant 0 : i32
    %c0_i32_0 = arith.constant 0 : i32
    %c0_i32_1 = arith.constant 0 : i32
    return %c0_i32, %c0_i32_0 : i32, i32
  }
  func.func @transform_3(%arg0: i32) -> (i32, i32) {
    %c0_i32 = arith.constant 0 : i32
    %c0_i32_0 = arith.constant 0 : i32
    %c0_i32_1 = arith.constant 0 : i32
    return %c0_i32, %c0_i32_0 : i32, i32
  }
  func.func @transform_4(%arg0: i32) -> (i32, i32) {
    %c0_i32 = arith.constant 0 : i32
    %c0_i32_0 = arith.constant 0 : i32
    %c0_i32_1 = arith.constant 0 : i32
    return %c0_i32, %c0_i32_0 : i32, i32
  }
  func.func @transform_5(%arg0: i32) -> (i32, i32) {
    %c0_i32 = arith.constant 0 : i32
    %c0_i32_0 = arith.constant 0 : i32
    %c0_i32_1 = arith.constant 0 : i32
    return %c0_i32, %c0_i32_0 : i32, i32
  }
  func.func @transform_6(%arg0: i32) -> (i32, i32) {
    %c0_i32 = arith.constant 0 : i32
    %c0_i32_0 = arith.constant 0 : i32
    %c0_i32_1 = arith.constant 0 : i32
    return %c0_i32, %c0_i32_0 : i32, i32
  }
  func.func @transform_7(%arg0: i32) -> (i32, i32) {
    %c0_i32 = arith.constant 0 : i32
    %c0_i32_0 = arith.constant 0 : i32
    %c0_i32_1 = arith.constant 0 : i32
    return %c0_i32, %c0_i32_0 : i32, i32
  }
  func.func @transform_8(%arg0: i32) -> (i32, i32) {
    %c0_i32 = arith.constant 0 : i32
    %c0_i32_0 = arith.constant 0 : i32
    %c0_i32_1 = arith.constant 0 : i32
    return %c0_i32, %c0_i32_0 : i32, i32
  }
  func.func @transform_9(%arg0: i32) -> (i32, i32) {
    %c0_i32 = arith.constant 0 : i32
    %c0_i32_0 = arith.constant 0 : i32
    return %arg0, %c0_i32 : i32, i32
  }
}

</mosaic_0001>

<bundles_post_ra>
// kernel: tpu_custom_call.1
= control target key start
LH: loop header
LB: loop body
LE: loop exit
PB: predicated region body
PF: predicated region fallthrough
CT: control target
= control target key end

     0   :  { %14 = vsyncpa [#allocation3], 0  ;;  %s859_s0 = inlined_call_operand.hbm [shape: f32[8,16], index: 0, kind: input, shape index: {}]   ;;  %s860_s1 = inlined_call_operand.hbm [shape: f32[16,32], index: 1, kind: input, shape index: {}]   ;;  %s861_s2 = inlined_call_operand.vmem [shape: f32[1,32], index: 2, kind: input, shape index: {}]   ;;  %s862_s3 = inlined_call_operand.hbm [shape: f32[32,32], index: 3, kind: input, shape index: {}]   ;;  %s863_s4 = inlined_call_operand.vmem [shape: f32[1,32], index: 4, kind: input, shape index: {}]   ;;  %s864_s5 = inlined_call_operand.hbm [shape: f32[32,32], index: 5, kind: input, shape index: {}]   ;;  %s865_s6 = inlined_call_operand.vmem [shape: f32[1,32], index: 6, kind: input, shape index: {}]   ;;  %s866_s7 = inlined_call_operand.hbm [shape: f32[32,128], index: 7, kind: input, shape index: {}]   ;;  %s867_s8 = inlined_call_operand.vmem [shape: f32[1,128], index: 8, kind: input, shape index: {}]   ;;  %s868_s9 = inlined_call_operand.hbm [shape: f32[8,128], index: 9, kind: output, shape index: {}]  }
   0x1   :  { %15 = vsyncpa [#allocation6], 0 }
   0x2   :  { %16 = vsyncpa [#allocation9], 0 }
   0x3   :  { %17 = vsyncpa [#allocation4], 0  ;;  %s695_s30 = smov [#allocation5]   ;;  %s555_s13 = scalar_lea.hbm %s860_s1, 256 }
   0x4   :  { %s33_s10 = sshll.u32 %s695_s30, 4  ;;  %p556_p0 = scmp.ne.s32.totalorder %s860_s1, %s555_s13  ;;  %s34_s10 = int_to_ptr.vmem [resolvable:$true] %s33_s10 }
   0x5   :  { %p559_p1 = scmp.lt.u32.totalorder %s555_s13, %s860_s1 }
   0x7   :  { %p561_p2 = pnand %p559_p1, %p556_p0 }
   0x9   :  { %564 = shalt.err (!%p561_p2)
}
   0xa   :  { %s565_s18 = scalar_lea.vmem %s34_s10, 256  ;;  %p570_p4 = scmp.lt.s32.totalorder %s34_s10, %s34_s10 }
   0xb   :  { %p566_p3 = scmp.ne.s32.totalorder %s34_s10, %s565_s18  ;;  %p571_p5 = scmp.lt.s32.totalorder %s565_s18, %s565_s18 }
   0xd   :  { %p572_p6 = por %p571_p5, %p570_p4 }
   0xf   :  { %p573_p7 = pnand %p572_p6, %p566_p3 }
  0x11   :  { %576 = shalt.err (!%p573_p7)
}
  0x12   :  { %s696_s19 = smov 128   ;;  %s697_s20 = smov 8  }
  0x13   :  { %39 = dma.hbm_to_vmem [thread:$0]  %s860_s1, 256, %s34_s10, [#allocation6], %s696_s19, %s696_s19, %s697_s20  }
  0x14   :  { %s698_s23 = smov [#allocation8]   ;;  %s699_s25 = smov [#allocation2]  }
  0x15   :  { %s61_s24 = sshll.u32 %s698_s23, 4  ;;  %s24_s26 = sshll.u32 %s699_s25, 4  ;;  %s62_s24 = int_to_ptr.vmem [resolvable:$true] %s61_s24  ;;  %s25_s26 = int_to_ptr.vmem [resolvable:$true] %s24_s26 }
  0x16   :  { %s577_s29 = scalar_lea.hbm %s864_s5, 512 }
  0x17   :  { %p578_p8 = scmp.ne.s32.totalorder %s864_s5, %s577_s29  ;;  %p581_p9 = scmp.lt.u32.totalorder %s577_s29, %s864_s5 }
  0x19   :  { %p583_p10 = pnand %p581_p9, %p578_p8 }
  0x1b   :  { %586 = shalt.err (!%p583_p10)
}
  0x1c   :  { %s587_s1 = scalar_lea.vmem %s62_s24, 512  ;;  %p592_p12 = scmp.lt.s32.totalorder %s62_s24, %s62_s24 }
  0x1d   :  { %p588_p11 = scmp.ne.s32.totalorder %s62_s24, %s587_s1  ;;  %p593_p13 = scmp.lt.s32.totalorder %s587_s1, %s587_s1 }
  0x1f   :  { %p594_p0 = por %p593_p13, %p592_p12 }
  0x21   :  { %p595_p1 = pnand %p594_p0, %p588_p11 }
  0x23   :  { %598 = shalt.err (!%p595_p1)
}
  0x24   :  { %67 = dma.hbm_to_vmem [thread:$0]  %s864_s5, 512, %s62_s24, [#allocation9], %s696_s19, %s696_s19, %s697_s20  }
  0x25   :  { %s599_s17 = scalar_lea.hbm %s859_s0, 128 }
  0x26   :  { %p600_p2 = scmp.ne.s32.totalorder %s859_s0, %s599_s17  ;;  %p603_p3 = scmp.lt.u32.totalorder %s599_s17, %s859_s0 }
  0x28   :  { %p605_p4 = pnand %p603_p3, %p600_p2 }
  0x2a   :  { %608 = shalt.err (!%p605_p4)
}
  0x2b   :  { %s609_s25 = scalar_lea.vmem %s25_s26, 128  ;;  %p614_p6 = scmp.lt.s32.totalorder %s25_s26, %s25_s26 }
  0x2c   :  { %p610_p5 = scmp.ne.s32.totalorder %s25_s26, %s609_s25  ;;  %p615_p7 = scmp.lt.s32.totalorder %s609_s25, %s609_s25 }
  0x2e   :  { %p616_p8 = por %p615_p7, %p614_p6 }
  0x30   :  { %p617_p9 = pnand %p616_p8, %p610_p5 }
  0x32   :  { %620 = shalt.err (!%p617_p9)
}
  0x33   :  { %27 = dma.hbm_to_vmem [thread:$0]  %s859_s0, 128, %s25_s26, [#allocation3]  }
  0x34   :  { %s700_s27 = smov [#allocation7]   ;;  %s701_s29 = smov [#allocation10]  }
  0x35   :  { %s47_s28 = sshll.u32 %s700_s27, 4  ;;  %s75_s30 = sshll.u32 %s701_s29, 4  ;;  %s48_s28 = int_to_ptr.vmem [resolvable:$true] %s47_s28  ;;  %s76_s30 = int_to_ptr.vmem [resolvable:$true] %s75_s30 }
  0x36   :  { %s621_s13 = scalar_lea.hbm %s862_s3, 512 }
  0x37   :  { %p622_p10 = scmp.ne.s32.totalorder %s862_s3, %s621_s13  ;;  %p625_p11 = scmp.lt.u32.totalorder %s621_s13, %s862_s3 }
  0x39   :  { %p627_p12 = pnand %p625_p11, %p622_p10 }
  0x3b   :  { %630 = shalt.err (!%p627_p12)
}
  0x3c   :  { %s631_s0 = scalar_lea.vmem %s48_s28, 512  ;;  %p636_p0 = scmp.lt.s32.totalorder %s48_s28, %s48_s28 }
  0x3d   :  { %p632_p13 = scmp.ne.s32.totalorder %s48_s28, %s631_s0  ;;  %p637_p1 = scmp.lt.s32.totalorder %s631_s0, %s631_s0 }
  0x3f   :  { %p638_p2 = por %p637_p1, %p636_p0 }
  0x41   :  { %p639_p3 = pnand %p638_p2, %p632_p13 }
  0x43   :  { %642 = shalt.err (!%p639_p3)
}
  0x44   :  { %53 = dma.hbm_to_vmem [thread:$0]  %s862_s3, 512, %s48_s28, [#allocation6], %s696_s19, %s696_s19, %s697_s20  }
  0x45   :  { %s643_s21 = scalar_lea.hbm %s866_s7, 512 }
  0x46   :  { %p644_p4 = scmp.ne.s32.totalorder %s866_s7, %s643_s21  ;;  %p647_p5 = scmp.lt.u32.totalorder %s643_s21, %s866_s7 }
  0x48   :  { %p649_p6 = pnand %p647_p5, %p644_p4 }
  0x4a   :  { %652 = shalt.err (!%p649_p6)
}
  0x4b   :  { %s653_s24 = scalar_lea.vmem %s76_s30, 512  ;;  %p658_p8 = scmp.lt.s32.totalorder %s76_s30, %s76_s30 }
  0x4c   :  { %p654_p7 = scmp.ne.s32.totalorder %s76_s30, %s653_s24  ;;  %p659_p9 = scmp.lt.s32.totalorder %s653_s24, %s653_s24 }
  0x4e   :  { %p660_p10 = por %p659_p9, %p658_p8 }
  0x50   :  { %p661_p11 = pnand %p660_p10, %p654_p7 }
  0x52   :  { %664 = shalt.err (!%p661_p11)
}
  0x53   :  { %81 = dma.hbm_to_vmem [thread:$0]  %s866_s7, 512, %s76_s30, [#allocation9], %s696_s19, %s696_s19, %s697_s20  }
  0x54   :  { %687 = dma.done.wait [#allocation3], 128  }
  0x55   :  { %688 = vsyncadd [#allocation3], 4294967168 }
  0x56   :  { %689 = dma.done.wait [#allocation6], 768  }
  0x57   :  { %690 = vsyncadd [#allocation6], 4294966528 }
  0x58   :  { %691 = dma.done.wait [#allocation9], 1024  }
  0x59   :  { %692 = vsyncadd [#allocation9], 4294966272  ;;  %v702_v0 = vmov 0.0|0.0   ;;  %vm703_vm0 = vmmov 0   ;;  %v704_v1 = vmov 0.0   ;;  %v100_v2 = vld [vmem:[#allocation5] sm:$0xff] }
  0x5a   :  { %523 = vmatprep.subr.bf16.mxu0 %v702_v0  ;;  %487 = vmatprep.mubr.msk.f32.mxu0 %vm703_vm0, %v704_v1  ;;  %v101_v3 = vld [vmem:[#allocation5 + $0x8] sm:$0xff]  ;;  %v184_v5 = vld [vmem:[#allocation7] sm:$0xff]  ;;  %v185_v6 = vld [vmem:[#allocation7 + $0x8] sm:$0xff]  ;;  %vm109_vm1 = vcmask 130048   ;;  %vm195_vm2 = vcmask 261120   ;;  %s705_s11 = smov [#allocation11]  }
  0x5b   :  { %526 = vmatprep.subr.bf16.mxu1 %v702_v0  ;;  %498 = vmatprep.mubr.msk.f32.mxu1 %vm703_vm0, %v704_v1  ;;  %v524_v4 = vpack.c.bf16 %v101_v3, %v100_v2  ;;  %v527_v7 = vpack.c.bf16 %v185_v6, %v184_v5  ;;  %v99_v8 = vld [vmem:[#allocation2] sm:$0xff]  ;;  %v186_v9 = vld [vmem:[#allocation7 + $0x10] sm:$0xff]  ;;  %v187_v10 = vld [vmem:[#allocation7 + $0x18] sm:$0xff]  ;;  %s446_s12 = sshll.u32 %s705_s11, 4  ;;  %s447_s12 = int_to_ptr.vmem [resolvable:$true] %s446_s12 }
  0x5c   :  { %v530_v11 = vpack.c.bf16 %v187_v10, %v186_v9  ;;  %v270_v12 = vld [vmem:[#allocation8] sm:$0xff]  ;;  %v271_v13 = vld [vmem:[#allocation8 + $0x8] sm:$0xff]  ;;  %v272_v20 = vld [vmem:[#allocation8 + $0x10] sm:$0xff]  ;;  %s665_s13 = scalar_lea.vmem %s447_s12, 128  ;;  %p670_p13 = scmp.lt.s32.totalorder %s447_s12, %s447_s12 }
  0x5d   :  { %525 = vmatpush3.bf16.msra.mxu0 %v524_v4  ;;  %528 = vmatpush3.bf16.msra.mxu1 %v527_v7  ;;  %v533_v14 = vpack.c.bf16 %v271_v13, %v270_v12  ;;  %v457_v15 = vld [vmem:[%s861_s2] ss:$0 sm:$0xff]  ;;  %v273_v21 = vld [vmem:[#allocation8 + $0x18] sm:$0xff]  ;;  %v355_v23 = vld [vmem:[#allocation10] sm:$0xff]  ;;  %p666_p12 = scmp.ne.s32.totalorder %s447_s12, %s665_s13  ;;  %p671_p0 = scmp.lt.s32.totalorder %s665_s13, %s665_s13 }
  0x5e   :  { %532 = vmatprep.subr.bf16.mxu0 %v702_v0  ;;  %529 = vmatprep.subr.bf16.mxu1 %v702_v0  ;;  %v536_v22 = vpack.c.bf16 %v273_v21, %v272_v20  ;;  %v356_v24 = vld [vmem:[#allocation10 + $0x8] sm:$0xff]  ;;  %v357_v31 = vld [vmem:[#allocation10 + $0x10] sm:$0xff]  ;;  %v358_v32 = vld [vmem:[#allocation10 + $0x18] sm:$0xff] }
  0x5f   :  { %v539_v25 = vpack.c.bf16 %v356_v24, %v355_v23  ;;  %v459_v26 = vld [vmem:[%s863_s4] ss:$0 sm:$0xff]  ;;  %v542_v33 = vpack.c.bf16 %v358_v32, %v357_v31  ;;  %p672_p1 = por %p671_p0, %p670_p13 }
  0x60   :  { %488 = vmatmul.mubr.msk.f32.vlgmr.msra.gmra.mrb[0].mxu0 %vm109_vm1, %v99_v8  ;;  %v461_v34 = vld [vmem:[%s865_s6] ss:$0 sm:$0xff] }
  0x61   :  { %509 = vmatprep.mubr.msk.f32.mxu0 %vm703_vm0, %v704_v1  ;;  %531 = vmatpush3.bf16.msra.mxu1 %v530_v11  ;;  %v463_v39 = vld [vmem:[%s867_s8] ss:$0 sm:$0xff]  ;;  %p673_p2 = pnand %p672_p1, %p666_p12 }
  0x62   :  { %538 = vmatprep.subr.bf16.mxu1 %v702_v0  ;;  %534 = vmatpush3.bf16.msra.mxu0 %v533_v14 }
  0x63   :  { %535 = vmatprep.subr.bf16.mxu0 %v702_v0 }
  0x66   :  { %537 = vmatpush3.bf16.msra.mxu0 %v536_v22 }
 0x133   :  { %v179_v16 = vpop.f32.mrb[0].mxu0 }
 0x134   :  { %v180_v17 = vadd.f32 %v457_v15, %v179_v16  ;;  %v489_v18 = vpop.f32.mrb[1].mxu0 }
 0x136   :  { %v183_v19 = vmax.f32 %v180_v17, 0.0 }
 0x138   :  { %499 = vmatmul.mubr.msk.f32.vlgmr.msra.gmra.mrb[0].mxu1 %vm195_vm2, %v183_v19 }
 0x139   :  { %520 = vmatprep.mubr.msk.f32.mxu1 %vm703_vm0, %v704_v1  ;;  %540 = vmatpush3.bf16.msra.mxu1 %v539_v25 }
 0x13a   :  { %541 = vmatprep.subr.bf16.mxu1 %v702_v0 }
 0x13d   :  { %543 = vmatpush3.bf16.msra.mxu1 %v542_v33 }
 0x20b   :  { %v265_v27 = vpop.f32.mrb[0].mxu1 }
 0x20c   :  { %v266_v28 = vadd.f32 %v459_v26, %v265_v27  ;;  %v500_v29 = vpop.f32.mrb[1].mxu1 }
 0x20e   :  { %v269_v30 = vmax.f32 %v266_v28, 0.0 }
 0x210   :  { %510 = vmatmul.mubr.msk.f32.vlgmr.msra.gmra.mrb[2].mxu0 %vm195_vm2, %v269_v30 }
 0x2e3   :  { %v350_v35 = vpop.f32.mrb[2].mxu0 }
 0x2e4   :  { %v351_v36 = vadd.f32 %v461_v34, %v350_v35  ;;  %v511_v37 = vpop.f32.mrb[3].mxu0 }
 0x2e6   :  { %v354_v38 = vmax.f32 %v351_v36, 0.0 }
 0x2e8   :  { %521 = vmatmul.mubr.msk.f32.vlgmr.msra.gmra.mrb[2].mxu1 %vm195_vm2, %v354_v38 }
 0x3bb   :  { %v435_v40 = vpop.f32.mrb[2].mxu1 }
 0x3bc   :  { %v436_v41 = vadd.f32 %v463_v39, %v435_v40  ;;  %v522_v42 = vpop.f32.mrb[3].mxu1 }
 0x3be   :  { %439 = vst [vmem:[#allocation11] sm:$0xff] %v436_v41 }
 0x3bf   :  { %676 = shalt.err (!%p673_p2)
}
 0x3c0   :  { %s677_s10 = scalar_lea.hbm %s868_s9, 128 }
 0x3c1   :  { %p678_p3 = scmp.ne.s32.totalorder %s868_s9, %s677_s10  ;;  %p681_p4 = scmp.lt.u32.totalorder %s677_s10, %s868_s9 }
 0x3c3   :  { %p683_p5 = pnand %p681_p4, %p678_p3 }
 0x3c5   :  { %686 = shalt.err (!%p683_p5)
}
 0x3c6   :  { %449 = dma.vmem_to_hbm [thread:$0]  %s447_s12, 128, %s868_s9, [#allocation4]  }
 0x3c7   :  { %693 = dma.done.wait [#allocation4], 128  }
 0x3c8   :  { %694 = vsyncadd [#allocation4], 4294967168 }
 0x3c9   :  { %453 = vsyncpa [#allocation3], 1 }
 0x3ca   :  { %454 = vsyncpa [#allocation6], 1 }
 0x3cb   :  { %455 = vsyncpa [#allocation9], 1 }
 0x3cc   :  { %456 = vsyncpa [#allocation4], 1 }

</bundles_post_ra>
